<compile_context>
chip_gen: v7x
topology: tpu7x:2x2x1
jax: 0.10.0
libtpu: 0.0.40
codegen_flags: <defaults>
</compile_context>

<pallas_src>
import jax
import jax.numpy as jnp
from jax import lax
from jax.experimental import pallas as pl
from jax.experimental.pallas import tpu as pltpu

_EPS = 1e-6  # matches torch: emb / (emb.norm(dim=1, keepdim=True) + 1e-06)


# ---------------------------------------------------------------------------
# Pre-pass: row-wise L2 normalization (runs once, O(M*E)).
# ---------------------------------------------------------------------------
def _normalize_kernel(x_ref, o_ref):
    x = x_ref[...].astype(jnp.float32)
    norm = jnp.sqrt(jnp.sum(x * x, axis=1, keepdims=True))
    o_ref[...] = x / (norm + _EPS)


def _normalize_call(emb, row_tile):
    Mp, E = emb.shape
    nblk = Mp // row_tile
    return pl.pallas_call(
        _normalize_kernel,
        out_shape=jax.ShapeDtypeStruct((Mp, E), jnp.float32),
        grid=(nblk,),
        in_specs=[pl.BlockSpec((row_tile, E), lambda i: (i, 0))],
        out_specs=pl.BlockSpec((row_tile, E), lambda i: (i, 0)),
        compiler_params=pltpu.CompilerParams(
            dimension_semantics=("parallel",)),
    )(emb)


# ---------------------------------------------------------------------------
# Monolithic (single VMEM tile) path for tiny graphs.
# ---------------------------------------------------------------------------
def _mono_kernel(emb_ref, adj_ref, loss_ref):
    emb = emb_ref[...].astype(jnp.float32)      # [M, E]
    adj = adj_ref[...].astype(jnp.float32)      # [M, M]

    norm = jnp.sqrt(jnp.sum(emb * emb, axis=1, keepdims=True))
    emb_n = emb / (norm + _EPS)                 # [M, E]

    # cos[p, q] = sum_e emb_n[p, e] * emb_n[q, e] -- contraction over E,
    # expressed directly (no explicit transpose of the VMEM operand).
    adj_pred = lax.dot_general(
        emb_n, emb_n,
        dimension_numbers=(((1,), (1,)), ((), ())),
        preferred_element_type=jnp.float32,
        precision=lax.Precision.HIGHEST,
    )                                            # [M, M]

    diff = adj - adj_pred
    loss = jnp.mean(diff * diff)

    # Dense (8,128) broadcast store (unmasked vst); caller reads [0, 0].
    loss_ref[...] = jnp.zeros_like(loss_ref) + loss


def _mono_call(emb, adj):
    M, E = emb.shape
    out = pl.pallas_call(
        _mono_kernel,
        out_shape=jax.ShapeDtypeStruct((8, 128), jnp.float32),
        in_specs=[
            pl.BlockSpec((M, E), lambda: (0, 0)),
            pl.BlockSpec((M, M), lambda: (0, 0)),
        ],
        out_specs=pl.BlockSpec((8, 128), lambda: (0, 0)),
    )(emb, adj)
    return out[0, 0]


# ---------------------------------------------------------------------------
# Tiled path: grid (i parallel, j arbitrary/reduction), pre-normalized emb.
# ---------------------------------------------------------------------------
def _make_tiled_kernel(tile, m_valid, ragged):
    def kernel(embn_i_ref, embn_j_ref, adj_ref, partial_ref):
        # Initialize this row block's resident (8,128) accumulator at j == 0.
        @pl.when(pl.program_id(1) == 0)
        def _init():
            partial_ref[...] = jnp.zeros_like(partial_ref)

        cos = lax.dot_general(
            embn_i_ref[...], embn_j_ref[...],
            dimension_numbers=(((1,), (1,)), ((), ())),
            preferred_element_type=jnp.float32,
            precision=lax.Precision.HIGHEST,
        )                                                    # [tile, tile]

        diff = adj_ref[...].astype(jnp.float32) - cos

        if ragged:
            # Mask the ragged edge tiles (adj is NOT padded in HBM).
            rows = (pl.program_id(0) * tile
                    + lax.broadcasted_iota(jnp.int32, (tile, tile), 0))
            cols = (pl.program_id(1) * tile
                    + lax.broadcasted_iota(jnp.int32, (tile, tile), 1))
            diff = jnp.where((rows < m_valid) & (cols < m_valid), diff, 0.0)

        d2 = diff * diff
        # Layout-preserving split into (sublane, lane) vreg tiles; the
        # axis-(0,2) sum is vreg-wise VPU adds (no cross-lane XLU reduce).
        partial_ref[...] += jnp.sum(
            d2.reshape(tile // 8, 8, tile // 128, 128), axis=(0, 2))

    return kernel


def _tiled_call(emb, adj, tile):
    M, E = emb.shape
    nblk = (M + tile - 1) // tile
    Mp = nblk * tile
    ragged = Mp != M

    # Cheap O(M*E) zero-pad of emb only (padded rows normalize to exactly 0).
    if ragged:
        emb = jnp.pad(emb, ((0, Mp - M), (0, 0)))

    emb_n = _normalize_call(emb, tile)            # [Mp, E] f32, normalized once

    partials = pl.pallas_call(
        _make_tiled_kernel(tile, M, ragged),
        out_shape=jax.ShapeDtypeStruct((nblk * 8, 128), jnp.float32),
        grid=(nblk, nblk),                        # reduction axis (j) last
        in_specs=[
            pl.BlockSpec((tile, E), lambda i, j: (i, 0)),      # rows, block i
            pl.BlockSpec((tile, E), lambda i, j: (j, 0)),      # rows, block j
            pl.BlockSpec((tile, tile), lambda i, j: (i, j)),   # adj tile
        ],
        out_specs=pl.BlockSpec((8, 128), lambda i, j: (i, 0)),
        compiler_params=pltpu.CompilerParams(
            dimension_semantics=("parallel", "arbitrary"),
            vmem_limit_bytes=32 * 1024 * 1024,
        ),
    )(emb_n, emb_n, adj)

    # Tiny XLA epilogue: sum all per-row-block vreg partials, divide by the
    # ORIGINAL M*M (padding / masked edges contributed exactly 0).
    return jnp.sum(partials) / (float(M) * float(M))


def _pick_tile(tile, M, E):
    assert tile % 128 == 0 and tile >= 128, "tile must be a multiple of 128"
    t = tile

    def footprint(t):
        # double-buffered emb_i / emb_j / adj blocks + live cos/diff/d2 temps
        return 4 * (2 * (2 * t * E + t * t) + 3 * t * t)

    # Stay comfortably within the scoped-VMEM budget.
    while t > 128 and (t // 2) % 128 == 0 and footprint(t) > 24 * 1024 * 1024:
        t //= 2
    # Give the parallel i axis >= 2 blocks so both v7x TensorCores get work.
    while t > 128 and (t // 2) % 128 == 0 and (M + t - 1) // t < 2:
        t //= 2
    return t


# ---------------------------------------------------------------------------
# Public wrapper.
# ---------------------------------------------------------------------------
def link_prediction_loss_cosine(emb, adj, *, tile=512, force_tiled=False):
    """emb: [M, E], adj: [M, M] -> scalar f32 loss (matches the torch module)."""
    M, E = emb.shape
    assert adj.shape == (M, M)

    # Mono path only for genuinely small graphs (gridless => no DMA/compute
    # overlap); count live f32: adj + adj_pred + diff (~3*M^2) + emb + emb_n.
    mono_bytes = 4 * (4 * M * M + 2 * M * E)
    if not force_tiled and M <= 512 and mono_bytes <= 6 * 1024 * 1024:
        return _mono_call(emb, adj)

    return _tiled_call(emb, adj, _pick_tile(tile, M, E))


def _reference_loss(emb, adj):
    norm = jnp.linalg.norm(emb, axis=1, keepdims=True)
    emb_n = emb / (norm + _EPS)
    adj_pred = jnp.matmul(emb_n, emb_n.T, precision=jax.lax.Precision.HIGHEST)
    return jnp.mean((adj - adj_pred) ** 2)


if __name__ == "__main__":
    key = jax.random.PRNGKey(0)
    k1, k2, k3, k4 = jax.random.split(key, 4)

    # Small graph (monolithic single-tile path): 8 nodes, 32-dim embeddings.
    M, E = 8, 32
    emb = jax.random.normal(k1, (M, E), dtype=jnp.float32)
    a = (jax.random.uniform(k2, (M, M)) > 0.5).astype(jnp.float32)
    adj = jnp.maximum(a, a.T)

    loss_small = link_prediction_loss_cosine(emb, adj)
    jax.block_until_ready(loss_small)
    ref_small = _reference_loss(emb, adj)
    assert jnp.allclose(loss_small, ref_small, atol=1e-5, rtol=1e-4), (
        loss_small, ref_small)

    # Medium graph forced onto the tiled path: exercises the pre-normalization
    # pass, the ragged-edge iota mask (200 % 128 != 0, adj NOT padded) and the
    # resident (8,128) vreg accumulator with (parallel, arbitrary) semantics.
    M2, E2 = 200, 96
    emb2 = jax.random.normal(k3, (M2, E2), dtype=jnp.float32)
    a2 = (jax.random.uniform(k4, (M2, M2)) > 0.5).astype(jnp.float32)
    adj2 = jnp.maximum(a2, a2.T)

    loss_med = link_prediction_loss_cosine(emb2, adj2, tile=128, force_tiled=True)
    jax.block_until_ready(loss_med)
    ref_med = _reference_loss(emb2, adj2)
    assert jnp.allclose(loss_med, ref_med, atol=1e-5, rtol=1e-4), (
        loss_med, ref_med)

    print("KERNEL_OK")
</pallas_src>

<mosaic_0001>
module attributes {stable_mosaic.version = 11 : i64} {
  func.func @_mono_kernel(%arg0: memref<8x32xf32, #tpu.memory_space<vmem>>, %arg1: memref<8x8xf32, #tpu.memory_space<vmem>>, %arg2: memref<8x128xf32, #tpu.memory_space<vmem>>) attributes {dimension_semantics = [], scalar_prefetch = 0 : i64, scratch_operands = 0 : i64, tpu.core_type = #tpu.core_type<tc>} {
    %c0 = arith.constant 0 : index
    %c0_0 = arith.constant 0 : index
    %0 = vector.load %arg0[%c0, %c0_0] : memref<8x32xf32, #tpu.memory_space<vmem>>, vector<8x32xf32>
    %c0_1 = arith.constant 0 : index
    %c0_2 = arith.constant 0 : index
    %1 = vector.load %arg1[%c0_1, %c0_2] : memref<8x8xf32, #tpu.memory_space<vmem>>, vector<8x8xf32>
    %2 = arith.mulf %0, %0 : vector<8x32xf32>
    %cst = arith.constant dense<0.000000e+00> : vector<8xf32>
    %3 = vector.multi_reduction <add>, %2, %cst [1] : vector<8x32xf32> to vector<8xf32>
    %4 = vector.shape_cast %3 : vector<8xf32> to vector<8x1xf32>
    %5 = math.sqrt %4 : vector<8x1xf32>
    %cst_3 = arith.constant 9.99999997E-7 : f32
    %6 = vector.broadcast %cst_3 : f32 to vector<8x1xf32>
    %7 = arith.addf %5, %6 : vector<8x1xf32>
    %8 = vector.broadcast %7 : vector<8x1xf32> to vector<8x32xf32>
    %9 = arith.divf %0, %8 : vector<8x32xf32>
    %cst_4 = arith.constant dense<0.000000e+00> : vector<8x8xf32>
    %10 = tpu.matmul %9, %9, %cst_4 {dimension_numbers = #tpu.dot_dimension_numbers<[1], [1], [0], [0], [0, 0, 1, 0], [], []>, precision = #tpu.contract_precision<fp32>} : vector<8x32xf32>, vector<8x32xf32>, vector<8x8xf32> -> vector<8x8xf32>
    %11 = arith.subf %1, %10 : vector<8x8xf32>
    %12 = arith.mulf %11, %11 : vector<8x8xf32>
    %13 = vector.shape_cast %12 : vector<8x8xf32> to vector<1x8x8xf32>
    %cst_5 = arith.constant dense<0.000000e+00> : vector<1xf32>
    %14 = vector.multi_reduction <add>, %13, %cst_5 [1, 2] : vector<1x8x8xf32> to vector<1xf32>
    %15 = vector.shape_cast %14 : vector<1xf32> to vector<1x1x1xf32>
    %16 = vector.extract %15[0, 0, 0] : f32 from vector<1x1x1xf32>
    %cst_6 = arith.constant 6.400000e+01 : f32
    %17 = arith.divf %16, %cst_6 : f32
    %cst_7 = arith.constant 0.000000e+00 : f32
    %18 = vector.broadcast %cst_7 : f32 to vector<8x128xf32>
    %19 = vector.broadcast %17 : f32 to vector<8x128xf32>
    %20 = arith.addf %18, %19 : vector<8x128xf32>
    %c0_8 = arith.constant 0 : index
    %c0_9 = arith.constant 0 : index
    %21 = vector.load %arg2[%c0_8, %c0_9] : memref<8x128xf32, #tpu.memory_space<vmem>>, vector<8x128xf32>
    tpu.vector_store %arg2[%c0_8, %c0_9], %20 {strides = array<i32>} : memref<8x128xf32, #tpu.memory_space<vmem>>, vector<8x128xf32>,
    return
  }
}

</mosaic_0001>

<bundles_post_ra>
// kernel: tpu_custom_call.1
= control target key start
LH: loop header
LB: loop body
LE: loop exit
PB: predicated region body
PF: predicated region fallthrough
CT: control target
= control target key end

     0   :  { %7 = vsyncpa [#allocation3], 0  ;;  %s735_s0 = inlined_call_operand.hbm [shape: f32[8,32], index: 0, kind: input, shape index: {}]   ;;  %s736_s1 = inlined_call_operand.hbm [shape: f32[8,8], index: 1, kind: input, shape index: {}]   ;;  %s737_s2 = inlined_call_operand.hbm [shape: f32[8,128], index: 2, kind: output, shape index: {}]  }
   0x1   :  { %8 = vsyncpa [#allocation6], 0 }
   0x2   :  { %9 = vsyncpa [#allocation4], 0  ;;  %s671_s9 = smov [#allocation2]   ;;  %s672_s11 = smov [#allocation5]  }
   0x3   :  { %s16_s10 = sshll.u32 %s671_s9, 4  ;;  %s26_s12 = sshll.u32 %s672_s11, 4  ;;  %s17_s10 = int_to_ptr.vmem [resolvable:$true] %s16_s10  ;;  %s27_s12 = int_to_ptr.vmem [resolvable:$true] %s26_s12 }
   0x4   :  { %s599_s15 = scalar_lea.hbm %s735_s0, 128 }
   0x5   :  { %p600_p0 = scmp.ne.s32.totalorder %s735_s0, %s599_s15  ;;  %p603_p1 = scmp.lt.u32.totalorder %s599_s15, %s735_s0 }
   0x7   :  { %p605_p2 = pnand %p603_p1, %p600_p0 }
   0x9   :  { %608 = shalt.err (!%p605_p2)
}
   0xa   :  { %s609_s20 = scalar_lea.vmem %s17_s10, 128  ;;  %p614_p4 = scmp.lt.s32.totalorder %s17_s10, %s17_s10 }
   0xb   :  { %p610_p3 = scmp.ne.s32.totalorder %s17_s10, %s609_s20  ;;  %p615_p5 = scmp.lt.s32.totalorder %s609_s20, %s609_s20 }
   0xd   :  { %p616_p6 = por %p615_p5, %p614_p4 }
   0xf   :  { %p617_p7 = pnand %p616_p6, %p610_p3 }
  0x11   :  { %620 = shalt.err (!%p617_p7)
}
  0x12   :  { %19 = dma.hbm_to_vmem [thread:$0]  %s735_s0, 128, %s17_s10, [#allocation3]  }
  0x13   :  { %s621_s25 = scalar_lea.hbm %s736_s1, 128 }
  0x14   :  { %p622_p8 = scmp.ne.s32.totalorder %s736_s1, %s621_s25  ;;  %p625_p9 = scmp.lt.u32.totalorder %s621_s25, %s736_s1 }
  0x16   :  { %p627_p10 = pnand %p625_p9, %p622_p8 }
  0x18   :  { %630 = shalt.err (!%p627_p10)
}
  0x19   :  { %s631_s30 = scalar_lea.vmem %s27_s12, 128  ;;  %p636_p12 = scmp.lt.s32.totalorder %s27_s12, %s27_s12 }
  0x1a   :  { %p632_p11 = scmp.ne.s32.totalorder %s27_s12, %s631_s30  ;;  %p637_p13 = scmp.lt.s32.totalorder %s631_s30, %s631_s30 }
  0x1c   :  { %p638_p0 = por %p637_p13, %p636_p12 }
  0x1e   :  { %p639_p1 = pnand %p638_p0, %p632_p11 }
  0x20   :  { %642 = shalt.err (!%p639_p1)
}
  0x21   :  { %29 = dma.hbm_to_vmem [thread:$0]  %s736_s1, 128, %s27_s12, [#allocation6]  }
  0x22   :  { %665 = dma.done.wait [#allocation3], 128  }
  0x23   :  { %666 = vsyncadd [#allocation3], 4294967168 }
  0x24   :  { %667 = dma.done.wait [#allocation6], 128  }
  0x25   :  { %668 = vsyncadd [#allocation6], 4294967168  ;;  %v36_v0 = vld [vmem:[#allocation2] sm:$0xff]  ;;  %vm39_vm0 = vcmask 261120   ;;  %v673_v3 = vmov 0.0   ;;  %vm674_vm1 = vmmov 0  }
  0x26   :  { %v38_v1 = vmul.f32 %v36_v0, %v36_v0  ;;  %549 = vmatprep.subr.mxu1 %v673_v3  ;;  %564 = vmatprep.subr.mxu0 %v673_v3  ;;  %v37_v21 = vld [vmem:[#allocation5] sm:$0xff]  ;;  %vm504_vm4 = vcmask 64512   ;;  %s675_s1 = smov [#allocation7]  }
  0x27   :  { %566 = vmatprep.mubr.msk.f32.mxu0 %vm674_vm1, %v673_v3  ;;  %551 = vmatprep.mubr.msk.f32.mxu1 %vm674_vm1, %v673_v3  ;;  %s527_s4 = sshll.u32 %s675_s1, 4  ;;  %s528_s4 = int_to_ptr.vmem [resolvable:$true] %s527_s4 }
  0x28   :  { %v40_v2 = vsel %vm39_vm0, %v38_v1, 0.0  ;;  %s643_s7 = scalar_lea.vmem %s528_s4, 128  ;;  %p648_p3 = scmp.lt.s32.totalorder %s528_s4, %s528_s4 }
  0x29   :  { %41 = vadd.xlane.f32.xlu0 %v40_v2  ;;  %p644_p2 = scmp.ne.s32.totalorder %s528_s4, %s643_s7  ;;  %p649_p4 = scmp.lt.s32.totalorder %s643_s7, %s643_s7 }
  0x2b   :  { %p650_p5 = por %p649_p4, %p648_p3 }
  0x2d   :  { %p651_p6 = pnand %p650_p5, %p644_p2 }
  0xb6   :  { %v42_v4 = vpop.xlane.xlu0 %41 }
  0xb7   :  { %595 = vrsqrt.f32 %v42_v4  ;;  %vm45_vm2 = vcmp.eq.f32.partialorder %v42_v4, inf  ;;  %v48_v7 = vand.u32 2147483648, %v42_v4  ;;  %vm47_vm3 = vcmp.eq.f32.partialorder %v42_v4, 0.0 }
  0xc1   :  { %v596_v5 = vpop.eup %595 }
  0xc2   :  { %v44_v6 = vmul.f32 %v596_v5, %v42_v4 }
  0xc4   :  { %v46_v8 = vsel %vm45_vm2, %v42_v4, %v44_v6 }
  0xc5   :  { %v49_v9 = vsel %vm47_vm3, %v48_v7, %v46_v8 }
  0xc6   :  { %v50_v10 = vadd.f32 1e-06, %v49_v9 }
  0xc8   :  { %597 = vrcp.f32 %v50_v10 }
  0xd2   :  { %v598_v11 = vpop.eup %597 }
  0xd3   :  { %v52_v12 = vmul.f32 %v598_v11, %v36_v0 }
  0xd5   :  { %v54_v13 = vsel %vm39_vm0, %v52_v12, 0 }
  0xd6   :  { %v57_v14 = vand.u32 4294901760, %v54_v13 }
  0xd8   :  { %550 = vmatpush3.xpose.msra.mxu1 %v57_v14  ;;  %565 = vmatpush3.xpose.msra.mxu0 %v57_v14  ;;  %v123_v15 = vsub.f32 %v54_v13, %v57_v14 }
  0xd9   :  { %569 = vmatprep.subr.mxu0 %v673_v3  ;;  %554 = vmatprep.subr.mxu1 %v673_v3 }
  0xda   :  { %v124_v16 = vand.u32 4294901760, %v123_v15 }
  0xdc   :  { %567 = vmatmul.mubr.f32.vlgmr.msra.gmra.mrb[0].mxu0 %v124_v16  ;;  %v125_v17 = vsub.f32 %v123_v15, %v124_v16 }
  0xdd   :  { %570 = vmatpush3.xpose.msra.mxu0 %v124_v16  ;;  %571 = vmatprep.mubr.msk.f32.mxu0 %vm674_vm1, %v673_v3 }
  0xde   :  { %v126_v18 = vand.u32 4294901760, %v125_v17  ;;  %574 = vmatprep.subr.mxu0 %v673_v3 }
  0xe0   :  { %552 = vmatmul.mubr.f32.vlgmr.msra.gmra.mrb[0].mxu1 %v126_v18 }
  0xe1   :  { %555 = vmatpush3.xpose.msra.mxu1 %v126_v18  ;;  %556 = vmatprep.mubr.msk.f32.mxu1 %vm674_vm1, %v673_v3 }
  0xe2   :  { %559 = vmatprep.subr.mxu1 %v673_v3 }
  0xe4   :  { %572 = vmatmul.mubr.f32.vlgmr.msra.gmra.mrb[0].mxu0 %v57_v14 }
  0xe5   :  { %575 = vmatpush3.xpose.msra.mxu0 %v57_v14  ;;  %576 = vmatprep.mubr.msk.f32.mxu0 %vm674_vm1, %v673_v3 }
  0xe8   :  { %557 = vmatmul.mubr.f32.vlgmr.msra.gmra.mrb[0].mxu1 %v57_v14 }
  0xe9   :  { %560 = vmatpush3.xpose.msra.mxu1 %v123_v15  ;;  %561 = vmatprep.mubr.msk.f32.mxu1 %vm674_vm1, %v673_v3 }
  0xec   :  { %577 = vmatmul.mubr.f32.vlgmr.msra.gmra.mrb[0].mxu0 %v57_v14 }
  0xf0   :  { %562 = vmatmul.mubr.f32.vlgmr.msra.gmra.mrb[0].mxu1 %v123_v15 }
 0x1bf   :  { %v498_v19 = vpop.f32.mrb[0].mxu0 }
 0x1c0   :  { %v578_v20 = vpop.f32.mrb[1].mxu0 }
 0x1c3   :  { %v278_v22 = vpop.f32.mrb[0].mxu1 }
 0x1c4   :  { %v579_v23 = vadd.f32 %v498_v19, %v278_v22  ;;  %v563_v24 = vpop.f32.mrb[1].mxu1 }
 0x1c6   :  { %v502_v25 = vsub.f32 %v37_v21, %v579_v23 }
 0x1c8   :  { %v503_v26 = vmul.f32 %v502_v25, %v502_v25 }
 0x1ca   :  { %v505_v27 = vsel %vm504_vm4, %v503_v26, 0.0 }
 0x1cb   :  { %506 = vadd.xlane.f32.xlu0 %v505_v27 }
 0x258   :  { %v507_v28 = vpop.xlane.xlu0 %506 }
 0x259   :  { %v508_v29 = vrot.slane %v507_v28, 4 }
 0x25b   :  { %v509_v30 = vadd.f32 %v508_v29, %v507_v28 }
 0x25d   :  { %v510_v31 = vrot.slane %v509_v30, 2 }
 0x25f   :  { %v511_v32 = vadd.f32 %v510_v31, %v509_v30 }
 0x261   :  { %v512_v33 = vrot.slane %v511_v32, 1 }
 0x263   :  { %v513_v34 = vadd.f32 %v512_v33, %v511_v32 }
 0x265   :  { %588 = vpush %v513_v34 }
 0x296   :  { %s589_s5 = spop %588 }
 0x297   :  { %s517_s6 = smul.f32 0.015625, %s589_s5 }
 0x299   :  { %v518_v35 = vstv %s517_s6 }
 0x29a   :  { %520 = vst [vmem:[#allocation7] sm:$0xff] %v518_v35 }
 0x29b   :  { %654 = shalt.err (!%p651_p6)
}
 0x29c   :  { %s655_s10 = scalar_lea.hbm %s737_s2, 128 }
 0x29d   :  { %p656_p7 = scmp.ne.s32.totalorder %s737_s2, %s655_s10  ;;  %p659_p8 = scmp.lt.u32.totalorder %s655_s10, %s737_s2 }
 0x29f   :  { %p661_p9 = pnand %p659_p8, %p656_p7 }
 0x2a1   :  { %664 = shalt.err (!%p661_p9)
}
 0x2a2   :  { %530 = dma.vmem_to_hbm [thread:$0]  %s528_s4, 128, %s737_s2, [#allocation4]  }
 0x2a3   :  { %669 = dma.done.wait [#allocation4], 128  }
 0x2a4   :  { %670 = vsyncadd [#allocation4], 4294967168 }
 0x2a5   :  { %534 = vsyncpa [#allocation3], 1 }
 0x2a6   :  { %535 = vsyncpa [#allocation6], 1 }
 0x2a7   :  { %536 = vsyncpa [#allocation4], 1 }

</bundles_post_ra>
